<compile_context>
chip_gen: v6e
topology: v6e:2x2x1
jax: 0.10.0
libtpu: 0.0.40
codegen_flags: <defaults>
</compile_context>

<pallas_src>
import jax
import jax.numpy as jnp
from jax.experimental import pallas as pl
from jax.experimental.pallas import tpu as pltpu

LANES = 128
SUBLANES = 8
_NQ = 6                   # accumulated quantities: p, p^2, bce, lab, p*lab, p^2*lab
_LOGIT_PAD = -30000.0     # finite sentinel: sigmoid -> 0 and softplus -> 0 exactly in f32


def _make_kernel(tile_rows, tiles_per_split, num_splits, valid_rows_last):
    n_groups = tile_rows // SUBLANES
    last_is_full = (valid_rows_last == tile_rows)   # static Python bool

    def kernel(logit_ref, lab_ref, acc_ref):
        c = pl.program_id(0)   # split ("parallel") axis — own resident accumulator block
        i = pl.program_id(1)   # streaming ("arbitrary") reduction axis

        @pl.when(i == 0)
        def _init():
            acc_ref[...] = jnp.zeros_like(acc_ref)

        x = logit_ref[...].astype(jnp.float32)     # (tile_rows, 128)
        lab = lab_ref[...].astype(jnp.float32)     # labels in {0,1}; pad/sentinel rows are 0

        # Exact, saturation-safe sigmoid / BCE via softplus (exp/log stay on the EUP slot):
        #   sp_neg = softplus(-x) = -log(sigmoid(x)); sp_pos = softplus(x) = -log(1 - sigmoid(x))
        t = jnp.exp(-jnp.abs(x))
        sp_neg = jnp.maximum(-x, 0.0) + jnp.log(1.0 + t)
        sp_pos = sp_neg + x
        p = jnp.exp(-sp_neg)                       # sigmoid(x); exactly 0 for sentinel pads
        p2 = p * p
        bce = sp_pos - lab * x                     # == -(y*log(p) + (1-y)*log(1-p)); 0 for pads
        quantities = (p, p2, bce, lab, p * lab, p2 * lab)

        def accumulate(mask):
            parts = []
            for q in quantities:
                if mask is not None:
                    # jnp.where (not multiply): NaN-safe against garbage rows of a
                    # partial (ragged) last block.
                    q = jnp.where(mask, q, 0.0)
                # VALU-only sublane-group reduction to a single (8,128) vreg.
                parts.append(jnp.sum(q.reshape(n_groups, SUBLANES, LANES), axis=0))
            # One read-modify-write of the resident (48,128) accumulator per tile.
            acc_ref[...] += jnp.concatenate(parts, axis=0)

        if last_is_full:
            accumulate(None)                       # every block is fully valid
        else:
            is_last = jnp.logical_and(c == num_splits - 1, i == tiles_per_split - 1)

            @pl.when(jnp.logical_not(is_last))
            def _full_tile():
                accumulate(None)

            @pl.when(is_last)
            def _ragged_tile():
                row = jax.lax.broadcasted_iota(jnp.int32, (tile_rows, LANES), 0)
                accumulate(row < valid_rows_last)

    return kernel


def aucp_loss(output, labels, *, alpha=0.5, lamb=2, tile_rows=2048, num_splits=None):
    """output: [B, C] float logits, labels: [B] or [B, 1] in {0, 1}.

    Returns (cls, alpha * penalty) matching AUCPLoss.forward (lamb=2 only).
    """
    if lamb != 2:
        # Only lamb=2 (module default) decomposes the pairwise mean into O(B) sums.
        raise NotImplementedError("only the module default lamb=2 is supported")
    B = output.shape[0]

    # Column-0 compaction is the only unavoidable XLA-side prep.  Keep native dtypes:
    # the kernel upcasts per tile, so bf16 logits / int8 labels halve HBM bytes.
    logit = output[:, 0].reshape(-1)
    lab = labels.reshape(-1)
    if lab.shape[0] != B:
        raise ValueError("labels must have B elements")

    # Lane-dense layout: (rows, 128) with rows a multiple of 8.  Pad with self-masking
    # sentinels (logit -> -30000 => sigmoid==0, label -> 0 => contributes nothing) only
    # when B is not already a multiple of 1024; otherwise it is a pure reshape.
    rows = SUBLANES * pl.cdiv(B, SUBLANES * LANES)
    total = rows * LANES
    if total != B:
        logit = jnp.pad(logit, (0, total - B), constant_values=_LOGIT_PAD)
        lab = jnp.pad(lab, (0, total - B))
    logit2d = logit.reshape(rows, LANES)
    lab2d = lab.reshape(rows, LANES)

    # Tile selection: biggest (8,128)-aligned tile that exists; ragged last block is
    # handled in-kernel (no whole-tile padding / dead-byte streaming).
    tile_rows = min(int(tile_rows), rows)
    tile_rows = max(SUBLANES, tile_rows - (tile_rows % SUBLANES))
    n_blocks = pl.cdiv(rows, tile_rows)
    if num_splits is None:
        # Leading "parallel" axis: sharded across TensorCores on megacore parts,
        # harmless (sequential) on single-core chips.  Only split when balanced.
        num_splits = 2 if (n_blocks >= 2 and n_blocks % 2 == 0) else 1
    if n_blocks % num_splits != 0:
        num_splits = 1
    tiles_per_split = n_blocks // num_splits
    valid_rows_last = rows - (n_blocks - 1) * tile_rows   # multiple of 8, in [8, tile_rows]

    kernel = _make_kernel(tile_rows, tiles_per_split, num_splits, valid_rows_last)
    elem_bytes = logit2d.dtype.itemsize + lab2d.dtype.itemsize

    acc = pl.pallas_call(
        kernel,
        out_shape=jax.ShapeDtypeStruct((num_splits * _NQ * SUBLANES, LANES), jnp.float32),
        grid=(num_splits, tiles_per_split),
        in_specs=[
            pl.BlockSpec((tile_rows, LANES), lambda c, i: (c * tiles_per_split + i, 0)),
            pl.BlockSpec((tile_rows, LANES), lambda c, i: (c * tiles_per_split + i, 0)),
        ],
        out_specs=pl.BlockSpec((_NQ * SUBLANES, LANES), lambda c, i: (c, 0)),
        compiler_params=pltpu.CompilerParams(
            dimension_semantics=("parallel", "arbitrary"),
            vmem_limit_bytes=48 * 1024 * 1024),
        cost_estimate=pl.CostEstimate(
            flops=20 * total,
            transcendentals=3 * total,
            bytes_accessed=elem_bytes * total
            + num_splits * _NQ * SUBLANES * LANES * 4),
    )(logit2d, lab2d)

    # Tiny cross-lane + scalar finalization on the XLA side.
    sums = acc.reshape(num_splits, _NQ, SUBLANES, LANES).sum(axis=(0, 2, 3))
    s_p_all, s_p2_all, s_bce, n_pos, s_p_pos, s_p2_pos = [sums[k] for k in range(_NQ)]

    n_valid = jnp.float32(B)
    n_neg = n_valid - n_pos
    s_p_neg = s_p_all - s_p_pos
    s_p2_neg = s_p2_all - s_p2_pos

    mp = jnp.where(n_pos > 0, s_p_pos / jnp.maximum(n_pos, 1.0), 0.0)
    mp2 = jnp.where(n_pos > 0, s_p2_pos / jnp.maximum(n_pos, 1.0), 0.0)
    mn = jnp.where(n_neg > 0, s_p_neg / jnp.maximum(n_neg, 1.0), 0.0)
    mn2 = jnp.where(n_neg > 0, s_p2_neg / jnp.maximum(n_neg, 1.0), 0.0)

    # E[(1 - P + N)^2] expansion; an empty side contributes 0 (matches the
    # trans_pos = 0 / trans_neg = 0 branches of the PyTorch forward).
    penalty = (1.0 + mp2 + mn2 - 2.0 * mp + 2.0 * mn - 2.0 * mp * mn) / float(lamb)
    bce_mean = s_bce / n_valid
    reg = alpha * penalty
    cls = bce_mean + reg
    # TODO(synk): the PyTorch forward's print('pos')/print('neg'), pdb NaN checks
    # and the unused SmoothL1Loss / num_hard are intentionally not reproduced.
    return cls, reg


def _reference(output, labels, alpha=0.5, lamb=2):
    """Pure-JAX (eager) reproduction of AUCPLoss.forward for verification."""
    probs = jax.nn.sigmoid(output[:, :1]).reshape(-1)
    lab = labels.reshape(-1)
    pos = probs[lab == 1.0]
    neg = probs[lab == 0.0]
    num_pos, num_neg = int(pos.shape[0]), int(neg.shape[0])
    if num_pos == 0:
        penalty = jnp.mean((1.0 - (0.0 - neg)) ** lamb) / lamb
    elif num_neg == 0:
        penalty = jnp.mean((1.0 - (pos - 0.0)) ** lamb) / lamb
    else:
        tp = jnp.tile(pos[None, :], (num_neg, 1))
        tn = jnp.tile(neg[:, None], (1, num_pos))
        penalty = jnp.mean((1.0 - (tp - tn)) ** lamb) / lamb
    bce = jnp.mean(-(lab * jnp.log(probs) + (1.0 - lab) * jnp.log(1.0 - probs)))
    cls = bce + alpha * penalty
    return cls, alpha * penalty


if __name__ == "__main__":
    key = jax.random.PRNGKey(0)

    # (B, C, tile_rows, label_mode) — small shapes exercising every kernel path:
    #   * B=8:    module-scale smoke test (single full-extent block) + empty-side branches
    #   * B=2500: lane padding + ragged (masked) last block + 2-way split
    #   * B=4096: no-pad path + multi-step accumulation per split
    cases = [
        (8, 4, 2048, "random"),
        (8, 4, 2048, "all_zero"),
        (8, 4, 2048, "all_one"),
        (2500, 1, 16, "random"),
        (4096, 2, 8, "random"),
    ]
    for B, C, tr, mode in cases:
        key, k1, k2 = jax.random.split(key, 3)
        output = jax.random.normal(k1, (B, C), dtype=jnp.float32)
        if mode == "random":
            labels = jax.random.bernoulli(k2, 0.5, (B, 1)).astype(jnp.float32)
        elif mode == "all_zero":
            labels = jnp.zeros((B, 1), jnp.float32)
        else:
            labels = jnp.ones((B, 1), jnp.float32)

        cls, reg = aucp_loss(output, labels, tile_rows=tr)
        jax.block_until_ready((cls, reg))

        ref_cls, ref_reg = _reference(output, labels)
        assert jnp.allclose(cls, ref_cls, atol=1e-4), (B, mode, cls, ref_cls)
        assert jnp.allclose(reg, ref_reg, atol=1e-4), (B, mode, reg, ref_reg)

    print("KERNEL_OK")
</pallas_src>

<mosaic_0001>
module attributes {stable_mosaic.version = 11 : i64} {
  func.func @kernel(%arg0: i32, %arg1: i32, %arg2: memref<8x128xf32, #tpu.memory_space<vmem>>, %arg3: memref<8x128xf32, #tpu.memory_space<vmem>>, %arg4: memref<48x128xf32, #tpu.memory_space<vmem>>) attributes {dimension_semantics = [#tpu.dimension_semantics<parallel>, #tpu.dimension_semantics<arbitrary>], iteration_bounds = array<i64: 1, 1>, scalar_prefetch = 0 : i64, scratch_operands = 0 : i64, tpu.core_type = #tpu.core_type<tc>, window_params = [{transform_indices = @transform_0, window_bounds = array<i64: 8, 128>}, {transform_indices = @transform_1, window_bounds = array<i64: 8, 128>}, {transform_indices = @transform_2, window_bounds = array<i64: 48, 128>}]} {
    %c0_i32 = arith.constant 0 : i32
    %0 = arith.cmpi eq, %arg1, %c0_i32 : i32
    %1 = arith.extui %0 : i1 to i32
    %c0_i32_0 = arith.constant 0 : i32
    %2 = arith.cmpi ne, %1, %c0_i32_0 : i32
    scf.if %2 {
      %cst_18 = arith.constant 0.000000e+00 : f32
      %42 = vector.broadcast %cst_18 : f32 to vector<48x128xf32>
      %c0_19 = arith.constant 0 : index
      %c0_20 = arith.constant 0 : index
      %43 = vector.load %arg4[%c0_19, %c0_20] : memref<48x128xf32, #tpu.memory_space<vmem>>, vector<48x128xf32>
      tpu.vector_store %arg4[%c0_19, %c0_20], %42 {strides = array<i32>} : memref<48x128xf32, #tpu.memory_space<vmem>>, vector<48x128xf32>,
    } else {
    }
    %c0 = arith.constant 0 : index
    %c0_1 = arith.constant 0 : index
    %3 = vector.load %arg2[%c0, %c0_1] : memref<8x128xf32, #tpu.memory_space<vmem>>, vector<8x128xf32>
    %c0_2 = arith.constant 0 : index
    %c0_3 = arith.constant 0 : index
    %4 = vector.load %arg3[%c0_2, %c0_3] : memref<8x128xf32, #tpu.memory_space<vmem>>, vector<8x128xf32>
    %5 = math.absf %3 : vector<8x128xf32>
    %cst = arith.constant 0.000000e+00 : f32
    %6 = vector.broadcast %cst : f32 to vector<8x128xf32>
    %7 = arith.subf %6, %5 : vector<8x128xf32>
    %8 = math.exp %7 : vector<8x128xf32>
    %cst_4 = arith.constant 0.000000e+00 : f32
    %9 = vector.broadcast %cst_4 : f32 to vector<8x128xf32>
    %10 = arith.subf %9, %3 : vector<8x128xf32>
    %cst_5 = arith.constant 0.000000e+00 : f32
    %11 = vector.broadcast %cst_5 : f32 to vector<8x128xf32>
    %12 = arith.maximumf %10, %11 : vector<8x128xf32>
    %cst_6 = arith.constant 1.000000e+00 : f32
    %13 = vector.broadcast %cst_6 : f32 to vector<8x128xf32>
    %14 = arith.addf %13, %8 : vector<8x128xf32>
    %15 = math.log %14 : vector<8x128xf32>
    %16 = arith.addf %12, %15 : vector<8x128xf32>
    %17 = arith.addf %16, %3 : vector<8x128xf32>
    %cst_7 = arith.constant 0.000000e+00 : f32
    %18 = vector.broadcast %cst_7 : f32 to vector<8x128xf32>
    %19 = arith.subf %18, %16 : vector<8x128xf32>
    %20 = math.exp %19 : vector<8x128xf32>
    %21 = arith.mulf %20, %20 : vector<8x128xf32>
    %22 = arith.mulf %4, %3 : vector<8x128xf32>
    %23 = arith.subf %17, %22 : vector<8x128xf32>
    %24 = arith.mulf %20, %4 : vector<8x128xf32>
    %25 = arith.mulf %21, %4 : vector<8x128xf32>
    %26 = vector.shape_cast %20 : vector<8x128xf32> to vector<1x8x128xf32>
    %cst_8 = arith.constant dense<0.000000e+00> : vector<8x128xf32>
    %27 = vector.multi_reduction <add>, %26, %cst_8 [0] : vector<1x8x128xf32> to vector<8x128xf32>
    %28 = vector.shape_cast %21 : vector<8x128xf32> to vector<1x8x128xf32>
    %cst_9 = arith.constant dense<0.000000e+00> : vector<8x128xf32>
    %29 = vector.multi_reduction <add>, %28, %cst_9 [0] : vector<1x8x128xf32> to vector<8x128xf32>
    %30 = vector.shape_cast %23 : vector<8x128xf32> to vector<1x8x128xf32>
    %cst_10 = arith.constant dense<0.000000e+00> : vector<8x128xf32>
    %31 = vector.multi_reduction <add>, %30, %cst_10 [0] : vector<1x8x128xf32> to vector<8x128xf32>
    %32 = vector.shape_cast %4 : vector<8x128xf32> to vector<1x8x128xf32>
    %cst_11 = arith.constant dense<0.000000e+00> : vector<8x128xf32>
    %33 = vector.multi_reduction <add>, %32, %cst_11 [0] : vector<1x8x128xf32> to vector<8x128xf32>
    %34 = vector.shape_cast %24 : vector<8x128xf32> to vector<1x8x128xf32>
    %cst_12 = arith.constant dense<0.000000e+00> : vector<8x128xf32>
    %35 = vector.multi_reduction <add>, %34, %cst_12 [0] : vector<1x8x128xf32> to vector<8x128xf32>
    %36 = vector.shape_cast %25 : vector<8x128xf32> to vector<1x8x128xf32>
    %cst_13 = arith.constant dense<0.000000e+00> : vector<8x128xf32>
    %37 = vector.multi_reduction <add>, %36, %cst_13 [0] : vector<1x8x128xf32> to vector<8x128xf32>
    %c0_14 = arith.constant 0 : index
    %c0_15 = arith.constant 0 : index
    %38 = vector.load %arg4[%c0_14, %c0_15] : memref<48x128xf32, #tpu.memory_space<vmem>>, vector<48x128xf32>
    %39 = tpu.concatenate %27, %29, %31, %33, %35, %37 in 0 : vector<8x128xf32>, vector<8x128xf32>, vector<8x128xf32>, vector<8x128xf32>, vector<8x128xf32>, vector<8x128xf32> -> vector<48x128xf32>
    %40 = arith.addf %38, %39 : vector<48x128xf32>
    %c0_16 = arith.constant 0 : index
    %c0_17 = arith.constant 0 : index
    %41 = vector.load %arg4[%c0_16, %c0_17] : memref<48x128xf32, #tpu.memory_space<vmem>>, vector<48x128xf32>
    tpu.vector_store %arg4[%c0_16, %c0_17], %40 {strides = array<i32>} : memref<48x128xf32, #tpu.memory_space<vmem>>, vector<48x128xf32>,
    return
  }
  func.func @transform_0(%arg0: i32, %arg1: i32) -> (i32, i32) {
    %c1_i32 = arith.constant 1 : i32
    %0 = arith.muli %arg0, %c1_i32 : i32
    %1 = arith.addi %0, %arg1 : i32
    %c0_i32 = arith.constant 0 : i32
    %c0_i32_0 = arith.constant 0 : i32
    return %1, %c0_i32 : i32, i32
  }
  func.func @transform_1(%arg0: i32, %arg1: i32) -> (i32, i32) {
    %c1_i32 = arith.constant 1 : i32
    %0 = arith.muli %arg0, %c1_i32 : i32
    %1 = arith.addi %0, %arg1 : i32
    %c0_i32 = arith.constant 0 : i32
    %c0_i32_0 = arith.constant 0 : i32
    return %1, %c0_i32 : i32, i32
  }
  func.func @transform_2(%arg0: i32, %arg1: i32) -> (i32, i32) {
    %c0_i32 = arith.constant 0 : i32
    %c0_i32_0 = arith.constant 0 : i32
    return %arg0, %c0_i32 : i32, i32
  }
}

</mosaic_0001>

<bundles_post_ra>
// kernel: tpu_custom_call.1
= control target key start
LH: loop header
LB: loop body
LE: loop exit
PB: predicated region body
PF: predicated region fallthrough
CT: control target
= control target key end

     0   :  { %7 = vsyncpa [#allocation3], 0  ;;  %s224_s0 = inlined_call_operand.hbm [shape: f32[8,128], index: 0, kind: input, shape index: {}]   ;;  %s225_s1 = inlined_call_operand.hbm [shape: f32[8,128], index: 1, kind: input, shape index: {}]   ;;  %s226_s2 = inlined_call_operand.hbm [shape: f32[48,128], index: 2, kind: output, shape index: {}]  }
   0x1   :  { %8 = vsyncpa [#allocation6], 0 }
   0x2   :  { %9 = vsyncpa [#allocation4], 0  ;;  %s195_s9 = smov [#allocation2]   ;;  %s196_s11 = smov [#allocation5]  }
   0x3   :  { %s19_s10 = sshll.u32 %s195_s9, 4  ;;  %s32_s12 = sshll.u32 %s196_s11, 4  ;;  %s20_s10 = int_to_ptr.vmem [resolvable:$true] %s19_s10  ;;  %s33_s12 = int_to_ptr.vmem [resolvable:$true] %s32_s12 }
   0x4   :  { %s137_s13 = scalar_lea.vmem %s20_s10, 128  ;;  %p142_p1 = scmp.lt.s32.totalorder %s20_s10, %s20_s10 }
   0x5   :  { %p138_p0 = scmp.ne.s32.totalorder %s20_s10, %s137_s13  ;;  %p143_p2 = scmp.lt.s32.totalorder %s137_s13, %s137_s13 }
   0x7   :  { %p144_p3 = por %p143_p2, %p142_p1 }
   0x9   :  { %p145_p4 = pnand %p144_p3, %p138_p0 }
   0xb   :  { %148 = shalt.err (!%p145_p4)
}
   0xc   :  { %22 = dma.hbm_to_vmem [thread:$0]  %s224_s0, 128, %s20_s10, [#allocation3]  }
   0xd   :  { %s157_s16 = scalar_lea.vmem %s33_s12, 128  ;;  %p162_p6 = scmp.lt.s32.totalorder %s33_s12, %s33_s12 }
   0xe   :  { %p158_p5 = scmp.ne.s32.totalorder %s33_s12, %s157_s16  ;;  %p163_p7 = scmp.lt.s32.totalorder %s157_s16, %s157_s16 }
  0x10   :  { %p164_p8 = por %p163_p7, %p162_p6 }
  0x12   :  { %p165_p9 = pnand %p164_p8, %p158_p5 }
  0x14   :  { %168 = shalt.err (!%p165_p9)
}
  0x15   :  { %35 = dma.hbm_to_vmem [thread:$0]  %s225_s1, 128, %s33_s12, [#allocation6]  }
  0x16   :  { %189 = dma.done.wait [#allocation3], 128  }
  0x17   :  { %190 = vsyncadd [#allocation3], 4294967168 }
  0x18   :  { %191 = dma.done.wait [#allocation6], 128  }
  0x19   :  { %192 = vsyncadd [#allocation6], 4294967168  ;;  %v54_v0 = vld [vmem:[#allocation2] sm:$0xff]  ;;  %v55_v1 = vld [vmem:[#allocation5] sm:$0xff]  ;;  %s197_s0 = smov [#allocation7]  }
  0x1a   :  { %v56_v2 = vand.u32 2147483647, %v54_v0  ;;  %96 = vst [vmem:[#allocation7 + $0x18] sm:$0xff] %v55_v1  ;;  %v60_v7 = vsub.f32 0.0, %v54_v0  ;;  %v71_v12 = vmul.f32 %v55_v1, %v54_v0  ;;  %s104_s1 = sshll.u32 %s197_s0, 4  ;;  %s105_s1 = int_to_ptr.vmem [resolvable:$true] %s104_s1 }
  0x1b   :  { %s169_s19 = scalar_lea.vmem %s105_s1, 768  ;;  %p174_p11 = scmp.lt.s32.totalorder %s105_s1, %s105_s1 }
  0x1c   :  { %v57_v3 = vsub.f32 0.0, %v56_v2  ;;  %v61_v8 = vmax.f32 %v60_v7, 0.0  ;;  %p170_p10 = scmp.ne.s32.totalorder %s105_s1, %s169_s19  ;;  %p175_p12 = scmp.lt.s32.totalorder %s169_s19, %s169_s19 }
  0x1e   :  { %v58_v4 = vmul.f32 1.442695, %v57_v3  ;;  %p176_p13 = por %p175_p12, %p174_p11 }
  0x20   :  { %123 = vpow2.f32 %v58_v4  ;;  %p177_p0 = pnand %p176_p13, %p170_p10 }
  0x2d   :  { %v124_v5 = vpop.eup %123 }
  0x2e   :  { %v62_v6 = vadd.f32 1.0, %v124_v5 }
  0x30   :  { %125 = vlog2.f32 %v62_v6 }
  0x3d   :  { %v126_v9 = vpop.eup %125 }
  0x3e   :  { %v64_v10 = vmul.f32 0.6931472, %v126_v9 }
  0x40   :  { %v65_v11 = vadd.f32 %v64_v10, %v61_v8 }
  0x42   :  { %v67_v13 = vsub.f32 0.0, %v65_v11  ;;  %v66_v14 = vadd.f32 %v65_v11, %v54_v0 }
  0x44   :  { %v68_v15 = vmul.f32 1.442695, %v67_v13  ;;  %v72_v16 = vsub.f32 %v66_v14, %v71_v12 }
  0x46   :  { %127 = vpow2.f32 %v68_v15  ;;  %95 = vst [vmem:[#allocation7 + $0x10] sm:$0xff] %v72_v16 }
  0x53   :  { %v128_v17 = vpop.eup %127 }
  0x54   :  { %v70_v18 = vmul.f32 %v128_v17, %v128_v17  ;;  %v73_v19 = vmul.f32 %v128_v17, %v55_v1  ;;  %93 = vst [vmem:[#allocation7] sm:$0xff] %v128_v17 }
  0x56   :  { %v74_v20 = vmul.f32 %v70_v18, %v55_v1  ;;  %94 = vst [vmem:[#allocation7 + $0x8] sm:$0xff] %v70_v18  ;;  %97 = vst [vmem:[#allocation7 + $0x20] sm:$0xff] %v73_v19 }
  0x58   :  { %98 = vst [vmem:[#allocation7 + $0x28] sm:$0xff] %v74_v20 }
  0x59   :  { %180 = shalt.err (!%p177_p0)
}
  0x5a   :  { %s198_s20 = smov 128   ;;  %s199_s21 = smov 8  }
  0x5b   :  { %110 = dma.vmem_to_hbm [thread:$0]  %s105_s1, 768, %s226_s2, [#allocation4], %s198_s20, %s198_s20, %s199_s21  }
  0x5c   :  { %193 = dma.done.wait [#allocation4], 768  }
  0x5d   :  { %194 = vsyncadd [#allocation4], 4294966528 }
  0x5e   :  { %114 = vsyncpa [#allocation3], 1 }
  0x5f   :  { %115 = vsyncpa [#allocation6], 1 }
  0x60   :  { %116 = vsyncpa [#allocation4], 1 }

</bundles_post_ra>
